<compile_context>
chip_gen: v5e
topology: v5e:2x2
jax: 0.10.0
libtpu: 0.0.40
codegen_flags: <defaults>
</compile_context>

<pallas_src>
import functools

import jax
import jax.numpy as jnp
import numpy as np
from jax.experimental import pallas as pl
from jax.experimental.pallas import tpu as pltpu

_LANE = 128
_SMOOTH = 1e-05


def _round_up(x, m):
    return ((x + m - 1) // m) * m


def _rowsum(v):
    """(B, R, 128) -> (1, 128): reduce batch + sublane axes, keep lanes."""
    return jnp.sum(jnp.sum(v, axis=0), axis=0, keepdims=True)


def _chip_tuning():
    """Return (n_tensorcores, vmem_limit_bytes) for the local chip."""
    kind = ""
    try:
        kind = jax.devices()[0].device_kind.lower()
    except Exception:  # pragma: no cover - defensive
        pass
    if "v7" in kind or "7x" in kind:
        # v7x: 2 TensorCores / chip, only 64 MiB VMEM per TC -> cap the budget.
        return 2, 40 * 1024 * 1024
    if "v6" in kind or "v5" in kind:
        # v5e / v6e: single TC, 128 MiB physical VMEM -> grow the tiles.
        return 1, 64 * 1024 * 1024
    # Unknown chip: conservative defaults.
    return 1, 32 * 1024 * 1024


def _dice_partial_kernel(x_ref, tgt_ref, inter_ref, zsum_ref, ysum_ref, *,
                         n_classes, fused_softmax):
    """Accumulate per-class partial sums for one spatial tile.

    x_ref:    (B, C, R, 128) scores (raw logits when fused_softmax)
    tgt_ref:  (B, R, 128)    int32 labels (-1 marks spatial padding)
    outputs:  (1, C, 128)    f32 per-lane partial sums; resident across the
                             inner ("arbitrary") grid axis -> act as accumulators.
    """
    t = pl.program_id(1)

    @pl.when(t == 0)
    def _init():
        inter_ref[...] = jnp.zeros_like(inter_ref)
        zsum_ref[...] = jnp.zeros_like(zsum_ref)
        ysum_ref[...] = jnp.zeros_like(ysum_ref)

    score = x_ref[...].astype(jnp.float32)               # (B, C, R, 128)
    tgt = tgt_ref[...]                                    # (B, R, 128) int32

    if fused_softmax:
        # Block holds the full class axis, so softmax over C fuses here.
        # exp and the approx reciprocal both run on the EUP slot; the padded
        # pixels (all-zero logits -> 1/C per class) are corrected analytically
        # in the wrapper instead of masked per element here.
        m = jnp.max(score, axis=1, keepdims=True)
        e = jnp.exp(score - m)
        score = e * pl.reciprocal(jnp.sum(e, axis=1, keepdims=True), approx=True)

    # z_sum = sum(score^2): per-lane partials, lane reduction deferred to host.
    zsum_ref[0, :, :] += jnp.sum(score * score, axis=(0, 2))        # (C, 128)

    # One-hot terms: per-class compare + multiply, but the C per-class (1,128)
    # row-sums are stacked and written with a single full-width RMW per output
    # (no per-class sub-vreg masked stores).  label == -1 (padding) never
    # matches any class, so padding contributes nothing here.
    inter_rows = []
    ysum_rows = []
    for i in range(n_classes):
        m_i = (tgt == i).astype(jnp.float32)                        # (B, R, 128)
        inter_rows.append(_rowsum(score[:, i] * m_i))               # (1, 128)
        ysum_rows.append(_rowsum(m_i))                              # (1, 128)
    inter_ref[0, :, :] += jnp.concatenate(inter_rows, axis=0)       # (C, 128)
    ysum_ref[0, :, :] += jnp.concatenate(ysum_rows, axis=0)         # (C, 128)


def dice_loss_pallas(inputs, target, n_classes, weight=None, softmax=False):
    """inputs: (B, C, H, W) float; target: (B, H, W) int labels. Returns scalar."""
    B, C, H, W = inputs.shape
    assert C == n_classes, f"predict C={C} & n_classes={n_classes} do not match"
    assert target.shape == (B, H, W)

    HW = H * W
    x = inputs.reshape(B, C, HW)                      # native layout, no transpose
    tgt = target.reshape(B, HW).astype(jnp.int32)

    n_cores, vmem_limit = _chip_tuning()

    # ---- tile sizing: lane-dense (rows, 128) layout, VMEM-budgeted row tiles.
    n_rows0 = pl.cdiv(HW, _LANE)

    score_itemsize = np.dtype(inputs.dtype).itemsize       # dtype-aware (bf16 ok)
    in_row = (B * C * score_itemsize + B * 4) * _LANE      # fresh HBM bytes / row
    work_row = 3 * B * C * 4 * _LANE                       # f32 cast + temps / row
    budget = int(0.6 * vmem_limit)                         # headroom for pipeline
    r_budget = max(8, (budget // (2 * in_row + work_row)) // 8 * 8)

    # Split the spatial range across TensorCores only where megacore exists
    # (v7x).  On single-TC chips the split just adds a serial pass + padding.
    n_splits = n_cores if (n_cores > 1 and n_rows0 >= 16) else 1

    if n_splits == 1 and n_rows0 <= r_budget:
        R = n_rows0                                   # full-extent row block
        steps = 1
    else:
        steps = pl.cdiv(n_rows0, n_splits * r_budget)
        R = _round_up(pl.cdiv(n_rows0, n_splits * steps), 8)
    n_rows_total = n_splits * steps * R
    hw_total = n_rows_total * _LANE

    pad = hw_total - HW
    if pad:
        x = jnp.pad(x, ((0, 0), (0, 0), (0, pad)))                    # zero logits
        tgt = jnp.pad(tgt, ((0, 0), (0, pad)), constant_values=-1)    # sentinel label

    x = x.reshape(B, C, n_rows_total, _LANE)
    tgt = tgt.reshape(B, n_rows_total, _LANE)

    kernel = functools.partial(
        _dice_partial_kernel,
        n_classes=n_classes,
        fused_softmax=bool(softmax),
    )

    out_sds = jax.ShapeDtypeStruct((n_splits, C, _LANE), jnp.float32)

    p_inter, p_z, p_y = pl.pallas_call(
        kernel,
        out_shape=(out_sds, out_sds, out_sds),
        grid_spec=pltpu.PrefetchScalarGridSpec(
            num_scalar_prefetch=0,
            grid=(n_splits, steps),
            in_specs=[
                pl.BlockSpec((B, C, R, _LANE),
                             lambda s, t: (0, 0, s * steps + t, 0)),
                pl.BlockSpec((B, R, _LANE),
                             lambda s, t: (0, s * steps + t, 0)),
            ],
            out_specs=[
                pl.BlockSpec((1, C, _LANE), lambda s, t: (s, 0, 0)),
                pl.BlockSpec((1, C, _LANE), lambda s, t: (s, 0, 0)),
                pl.BlockSpec((1, C, _LANE), lambda s, t: (s, 0, 0)),
            ],
        ),
        compiler_params=pltpu.CompilerParams(
            dimension_semantics=("parallel", "arbitrary"),
            vmem_limit_bytes=vmem_limit,
        ),
    )(x, tgt)

    # Tiny finalize: cross-split + cross-lane reduction, dice formula, weights.
    inter = jnp.sum(p_inter, axis=(0, 2))             # (C,)
    z_sum = jnp.sum(p_z, axis=(0, 2))
    y_sum = jnp.sum(p_y, axis=(0, 2))

    if softmax and pad:
        # Padded pixels carry all-zero logits, so softmax gives exactly 1/C per
        # class: they add B*pad/C^2 to every class's z_sum and nothing to
        # inter / y_sum (label == -1).  Correct analytically instead of masking
        # the whole tile in the kernel.
        z_sum = z_sum - (B * pad) / float(n_classes * n_classes)

    if weight is None:
        w = jnp.ones((n_classes,), jnp.float32)
    else:
        w = jnp.asarray(weight, jnp.float32).reshape(n_classes)

    dice = 1.0 - (2.0 * inter + _SMOOTH) / (z_sum + y_sum + _SMOOTH)
    return jnp.sum(dice * w) / n_classes


def dice_loss_ref(inputs, target, n_classes, weight=None, softmax=False):
    """Pure-JAX reference mirroring the PyTorch module."""
    if softmax:
        inputs = jax.nn.softmax(inputs.astype(jnp.float32), axis=1)
    inputs = inputs.astype(jnp.float32)
    onehot = jax.nn.one_hot(target, n_classes, axis=1, dtype=jnp.float32)
    if weight is None:
        weight = [1.0] * n_classes
    smooth = 1e-05
    loss = 0.0
    for i in range(n_classes):
        s = inputs[:, i]
        t = onehot[:, i]
        intersect = jnp.sum(s * t)
        y_sum = jnp.sum(t * t)
        z_sum = jnp.sum(s * s)
        d = 1.0 - (2.0 * intersect + smooth) / (z_sum + y_sum + smooth)
        loss = loss + d * weight[i]
    return loss / n_classes


if __name__ == "__main__":
    key = jax.random.PRNGKey(0)
    k1, k2 = jax.random.split(key)

    B, C, H, W = 2, 4, 16, 16
    inputs = jax.random.normal(k1, (B, C, H, W), dtype=jnp.float32)
    target = jax.random.randint(k2, (B, H, W), 0, C, dtype=jnp.int32)

    # Default forward path (softmax=False, weight=None), as in the PyTorch module.
    loss = dice_loss_pallas(inputs, target, n_classes=C)
    loss = jax.block_until_ready(loss)

    ref = jax.block_until_ready(dice_loss_ref(inputs, target, n_classes=C))
    assert np.allclose(np.asarray(loss), np.asarray(ref), rtol=1e-4, atol=1e-5), (
        f"pallas={loss} ref={ref}")

    # softmax=True + explicit per-class weights (fused in-kernel softmax path).
    # Tolerance is slightly looser because the softmax denominator uses the
    # EUP approx reciprocal (per the perf review); the error is well below
    # anything that matters for a loss value.
    wts = [1.0, 0.5, 2.0, 1.5]
    loss_sm = jax.block_until_ready(
        dice_loss_pallas(inputs, target, n_classes=C, weight=wts, softmax=True))
    ref_sm = jax.block_until_ready(
        dice_loss_ref(inputs, target, n_classes=C, weight=wts, softmax=True))
    assert np.allclose(np.asarray(loss_sm), np.asarray(ref_sm),
                       rtol=2e-3, atol=2e-4), f"pallas={loss_sm} ref={ref_sm}"

    print("KERNEL_OK")
</pallas_src>

<mosaic_0001>
module attributes {stable_mosaic.version = 11 : i64} {
  func.func @_dice_partial_kernel(%arg0: i32, %arg1: i32, %arg2: memref<2x4x2x128xf32, #tpu.memory_space<vmem>>, %arg3: memref<2x2x128xi32, #tpu.memory_space<vmem>>, %arg4: memref<1x4x128xf32, #tpu.memory_space<vmem>>, %arg5: memref<1x4x128xf32, #tpu.memory_space<vmem>>, %arg6: memref<1x4x128xf32, #tpu.memory_space<vmem>>) attributes {dimension_semantics = [#tpu.dimension_semantics<parallel>, #tpu.dimension_semantics<arbitrary>], iteration_bounds = array<i64: 1, 1>, scalar_prefetch = 0 : i64, scratch_operands = 0 : i64, tpu.core_type = #tpu.core_type<tc>, window_params = [{transform_indices = @transform_0, window_bounds = array<i64: 2, 4, 2, 128>}, {transform_indices = @transform_1, window_bounds = array<i64: 2, 2, 128>}, {transform_indices = @transform_2, window_bounds = array<i64: 1, 4, 128>}, {transform_indices = @transform_3, window_bounds = array<i64: 1, 4, 128>}, {transform_indices = @transform_4, window_bounds = array<i64: 1, 4, 128>}]} {
    %c0_i32 = arith.constant 0 : i32
    %0 = arith.cmpi eq, %arg1, %c0_i32 : i32
    %1 = arith.extui %0 : i1 to i32
    %c0_i32_0 = arith.constant 0 : i32
    %2 = arith.cmpi ne, %1, %c0_i32_0 : i32
    scf.if %2 {
      %cst_42 = arith.constant 0.000000e+00 : f32
      %79 = vector.broadcast %cst_42 : f32 to vector<1x4x128xf32>
      %c0_43 = arith.constant 0 : index
      %c0_44 = arith.constant 0 : index
      %c0_45 = arith.constant 0 : index
      %80 = vector.load %arg4[%c0_43, %c0_44, %c0_45] : memref<1x4x128xf32, #tpu.memory_space<vmem>>, vector<1x4x128xf32>
      tpu.vector_store %arg4[%c0_43, %c0_44, %c0_45], %79 {strides = array<i32>} : memref<1x4x128xf32, #tpu.memory_space<vmem>>, vector<1x4x128xf32>,
      %cst_46 = arith.constant 0.000000e+00 : f32
      %81 = vector.broadcast %cst_46 : f32 to vector<1x4x128xf32>
      %c0_47 = arith.constant 0 : index
      %c0_48 = arith.constant 0 : index
      %c0_49 = arith.constant 0 : index
      %82 = vector.load %arg5[%c0_47, %c0_48, %c0_49] : memref<1x4x128xf32, #tpu.memory_space<vmem>>, vector<1x4x128xf32>
      tpu.vector_store %arg5[%c0_47, %c0_48, %c0_49], %81 {strides = array<i32>} : memref<1x4x128xf32, #tpu.memory_space<vmem>>, vector<1x4x128xf32>,
      %cst_50 = arith.constant 0.000000e+00 : f32
      %83 = vector.broadcast %cst_50 : f32 to vector<1x4x128xf32>
      %c0_51 = arith.constant 0 : index
      %c0_52 = arith.constant 0 : index
      %c0_53 = arith.constant 0 : index
      %84 = vector.load %arg6[%c0_51, %c0_52, %c0_53] : memref<1x4x128xf32, #tpu.memory_space<vmem>>, vector<1x4x128xf32>
      tpu.vector_store %arg6[%c0_51, %c0_52, %c0_53], %83 {strides = array<i32>} : memref<1x4x128xf32, #tpu.memory_space<vmem>>, vector<1x4x128xf32>,
    } else {
    }
    %c0 = arith.constant 0 : index
    %c0_1 = arith.constant 0 : index
    %c0_2 = arith.constant 0 : index
    %c0_3 = arith.constant 0 : index
    %3 = vector.load %arg2[%c0, %c0_1, %c0_2, %c0_3] : memref<2x4x2x128xf32, #tpu.memory_space<vmem>>, vector<2x4x2x128xf32>
    %c0_4 = arith.constant 0 : index
    %c0_5 = arith.constant 0 : index
    %c0_6 = arith.constant 0 : index
    %4 = vector.load %arg3[%c0_4, %c0_5, %c0_6] : memref<2x2x128xi32, #tpu.memory_space<vmem>>, vector<2x2x128xi32>
    %c0_7 = arith.constant 0 : index
    %c0_8 = arith.constant 0 : index
    %c0_9 = arith.constant 0 : index
    %5 = vector.load %arg5[%c0_7, %c0_8, %c0_9] : memref<1x4x128xf32, #tpu.memory_space<vmem>>, vector<1x4x128xf32>
    %6 = vector.shape_cast %5 : vector<1x4x128xf32> to vector<4x128xf32>
    %7 = arith.mulf %3, %3 : vector<2x4x2x128xf32>
    %cst = arith.constant dense<0.000000e+00> : vector<4x128xf32>
    %8 = vector.multi_reduction <add>, %7, %cst [0, 2] : vector<2x4x2x128xf32> to vector<4x128xf32>
    %9 = arith.addf %6, %8 : vector<4x128xf32>
    %c0_10 = arith.constant 0 : index
    %c0_11 = arith.constant 0 : index
    %c0_12 = arith.constant 0 : index
    %10 = vector.load %arg5[%c0_10, %c0_11, %c0_12] : memref<1x4x128xf32, #tpu.memory_space<vmem>>, vector<1x4x128xf32>
    %11 = vector.shape_cast %10 : vector<1x4x128xf32> to vector<4x128xf32>
    %12 = vector.shape_cast %9 : vector<4x128xf32> to vector<1x4x128xf32>
    tpu.vector_store %arg5[%c0_10, %c0_11, %c0_12], %12 {strides = array<i32>} : memref<1x4x128xf32, #tpu.memory_space<vmem>>, vector<1x4x128xf32>,
    %c0_i32_13 = arith.constant 0 : i32
    %13 = vector.broadcast %c0_i32_13 : i32 to vector<2x2x128xi32>
    %14 = arith.cmpi eq, %4, %13 : vector<2x2x128xi32>
    %15 = arith.extui %14 : vector<2x2x128xi1> to vector<2x2x128xi32>
    %16 = arith.sitofp %15 : vector<2x2x128xi32> to vector<2x2x128xf32>
    %17 = vector.extract_strided_slice %3 {offsets = [0, 0, 0, 0], sizes = [2, 1, 2, 128], strides = [1, 1, 1, 1]} : vector<2x4x2x128xf32> to vector<2x1x2x128xf32>
    %18 = vector.shape_cast %17 : vector<2x1x2x128xf32> to vector<2x2x128xf32>
    %19 = arith.mulf %18, %16 : vector<2x2x128xf32>
    %cst_14 = arith.constant dense<0.000000e+00> : vector<2x128xf32>
    %20 = vector.multi_reduction <add>, %19, %cst_14 [0] : vector<2x2x128xf32> to vector<2x128xf32>
    %cst_15 = arith.constant dense<0.000000e+00> : vector<128xf32>
    %21 = vector.multi_reduction <add>, %20, %cst_15 [0] : vector<2x128xf32> to vector<128xf32>
    %22 = vector.shape_cast %21 : vector<128xf32> to vector<1x128xf32>
    %cst_16 = arith.constant dense<0.000000e+00> : vector<2x128xf32>
    %23 = vector.multi_reduction <add>, %16, %cst_16 [0] : vector<2x2x128xf32> to vector<2x128xf32>
    %cst_17 = arith.constant dense<0.000000e+00> : vector<128xf32>
    %24 = vector.multi_reduction <add>, %23, %cst_17 [0] : vector<2x128xf32> to vector<128xf32>
    %25 = vector.shape_cast %24 : vector<128xf32> to vector<1x128xf32>
    %c1_i32 = arith.constant 1 : i32
    %26 = vector.broadcast %c1_i32 : i32 to vector<2x2x128xi32>
    %27 = arith.cmpi eq, %4, %26 : vector<2x2x128xi32>
    %28 = arith.extui %27 : vector<2x2x128xi1> to vector<2x2x128xi32>
    %29 = arith.sitofp %28 : vector<2x2x128xi32> to vector<2x2x128xf32>
    %30 = vector.extract_strided_slice %3 {offsets = [0, 1, 0, 0], sizes = [2, 1, 2, 128], strides = [1, 1, 1, 1]} : vector<2x4x2x128xf32> to vector<2x1x2x128xf32>
    %31 = vector.shape_cast %30 : vector<2x1x2x128xf32> to vector<2x2x128xf32>
    %32 = arith.mulf %31, %29 : vector<2x2x128xf32>
    %cst_18 = arith.constant dense<0.000000e+00> : vector<2x128xf32>
    %33 = vector.multi_reduction <add>, %32, %cst_18 [0] : vector<2x2x128xf32> to vector<2x128xf32>
    %cst_19 = arith.constant dense<0.000000e+00> : vector<128xf32>
    %34 = vector.multi_reduction <add>, %33, %cst_19 [0] : vector<2x128xf32> to vector<128xf32>
    %35 = vector.shape_cast %34 : vector<128xf32> to vector<1x128xf32>
    %cst_20 = arith.constant dense<0.000000e+00> : vector<2x128xf32>
    %36 = vector.multi_reduction <add>, %29, %cst_20 [0] : vector<2x2x128xf32> to vector<2x128xf32>
    %cst_21 = arith.constant dense<0.000000e+00> : vector<128xf32>
    %37 = vector.multi_reduction <add>, %36, %cst_21 [0] : vector<2x128xf32> to vector<128xf32>
    %38 = vector.shape_cast %37 : vector<128xf32> to vector<1x128xf32>
    %c2_i32 = arith.constant 2 : i32
    %39 = vector.broadcast %c2_i32 : i32 to vector<2x2x128xi32>
    %40 = arith.cmpi eq, %4, %39 : vector<2x2x128xi32>
    %41 = arith.extui %40 : vector<2x2x128xi1> to vector<2x2x128xi32>
    %42 = arith.sitofp %41 : vector<2x2x128xi32> to vector<2x2x128xf32>
    %43 = vector.extract_strided_slice %3 {offsets = [0, 2, 0, 0], sizes = [2, 1, 2, 128], strides = [1, 1, 1, 1]} : vector<2x4x2x128xf32> to vector<2x1x2x128xf32>
    %44 = vector.shape_cast %43 : vector<2x1x2x128xf32> to vector<2x2x128xf32>
    %45 = arith.mulf %44, %42 : vector<2x2x128xf32>
    %cst_22 = arith.constant dense<0.000000e+00> : vector<2x128xf32>
    %46 = vector.multi_reduction <add>, %45, %cst_22 [0] : vector<2x2x128xf32> to vector<2x128xf32>
    %cst_23 = arith.constant dense<0.000000e+00> : vector<128xf32>
    %47 = vector.multi_reduction <add>, %46, %cst_23 [0] : vector<2x128xf32> to vector<128xf32>
    %48 = vector.shape_cast %47 : vector<128xf32> to vector<1x128xf32>
    %cst_24 = arith.constant dense<0.000000e+00> : vector<2x128xf32>
    %49 = vector.multi_reduction <add>, %42, %cst_24 [0] : vector<2x2x128xf32> to vector<2x128xf32>
    %cst_25 = arith.constant dense<0.000000e+00> : vector<128xf32>
    %50 = vector.multi_reduction <add>, %49, %cst_25 [0] : vector<2x128xf32> to vector<128xf32>
    %51 = vector.shape_cast %50 : vector<128xf32> to vector<1x128xf32>
    %c3_i32 = arith.constant 3 : i32
    %52 = vector.broadcast %c3_i32 : i32 to vector<2x2x128xi32>
    %53 = arith.cmpi eq, %4, %52 : vector<2x2x128xi32>
    %54 = arith.extui %53 : vector<2x2x128xi1> to vector<2x2x128xi32>
    %55 = arith.sitofp %54 : vector<2x2x128xi32> to vector<2x2x128xf32>
    %56 = vector.extract_strided_slice %3 {offsets = [0, 3, 0, 0], sizes = [2, 1, 2, 128], strides = [1, 1, 1, 1]} : vector<2x4x2x128xf32> to vector<2x1x2x128xf32>
    %57 = vector.shape_cast %56 : vector<2x1x2x128xf32> to vector<2x2x128xf32>
    %58 = arith.mulf %57, %55 : vector<2x2x128xf32>
    %cst_26 = arith.constant dense<0.000000e+00> : vector<2x128xf32>
    %59 = vector.multi_reduction <add>, %58, %cst_26 [0] : vector<2x2x128xf32> to vector<2x128xf32>
    %cst_27 = arith.constant dense<0.000000e+00> : vector<128xf32>
    %60 = vector.multi_reduction <add>, %59, %cst_27 [0] : vector<2x128xf32> to vector<128xf32>
    %61 = vector.shape_cast %60 : vector<128xf32> to vector<1x128xf32>
    %cst_28 = arith.constant dense<0.000000e+00> : vector<2x128xf32>
    %62 = vector.multi_reduction <add>, %55, %cst_28 [0] : vector<2x2x128xf32> to vector<2x128xf32>
    %cst_29 = arith.constant dense<0.000000e+00> : vector<128xf32>
    %63 = vector.multi_reduction <add>, %62, %cst_29 [0] : vector<2x128xf32> to vector<128xf32>
    %64 = vector.shape_cast %63 : vector<128xf32> to vector<1x128xf32>
    %c0_30 = arith.constant 0 : index
    %c0_31 = arith.constant 0 : index
    %c0_32 = arith.constant 0 : index
    %65 = vector.load %arg4[%c0_30, %c0_31, %c0_32] : memref<1x4x128xf32, #tpu.memory_space<vmem>>, vector<1x4x128xf32>
    %66 = vector.shape_cast %65 : vector<1x4x128xf32> to vector<4x128xf32>
    %67 = tpu.concatenate %22, %35, %48, %61 in 0 : vector<1x128xf32>, vector<1x128xf32>, vector<1x128xf32>, vector<1x128xf32> -> vector<4x128xf32>
    %68 = arith.addf %66, %67 : vector<4x128xf32>
    %c0_33 = arith.constant 0 : index
    %c0_34 = arith.constant 0 : index
    %c0_35 = arith.constant 0 : index
    %69 = vector.load %arg4[%c0_33, %c0_34, %c0_35] : memref<1x4x128xf32, #tpu.memory_space<vmem>>, vector<1x4x128xf32>
    %70 = vector.shape_cast %69 : vector<1x4x128xf32> to vector<4x128xf32>
    %71 = vector.shape_cast %68 : vector<4x128xf32> to vector<1x4x128xf32>
    tpu.vector_store %arg4[%c0_33, %c0_34, %c0_35], %71 {strides = array<i32>} : memref<1x4x128xf32, #tpu.memory_space<vmem>>, vector<1x4x128xf32>,
    %c0_36 = arith.constant 0 : index
    %c0_37 = arith.constant 0 : index
    %c0_38 = arith.constant 0 : index
    %72 = vector.load %arg6[%c0_36, %c0_37, %c0_38] : memref<1x4x128xf32, #tpu.memory_space<vmem>>, vector<1x4x128xf32>
    %73 = vector.shape_cast %72 : vector<1x4x128xf32> to vector<4x128xf32>
    %74 = tpu.concatenate %25, %38, %51, %64 in 0 : vector<1x128xf32>, vector<1x128xf32>, vector<1x128xf32>, vector<1x128xf32> -> vector<4x128xf32>
    %75 = arith.addf %73, %74 : vector<4x128xf32>
    %c0_39 = arith.constant 0 : index
    %c0_40 = arith.constant 0 : index
    %c0_41 = arith.constant 0 : index
    %76 = vector.load %arg6[%c0_39, %c0_40, %c0_41] : memref<1x4x128xf32, #tpu.memory_space<vmem>>, vector<1x4x128xf32>
    %77 = vector.shape_cast %76 : vector<1x4x128xf32> to vector<4x128xf32>
    %78 = vector.shape_cast %75 : vector<4x128xf32> to vector<1x4x128xf32>
    tpu.vector_store %arg6[%c0_39, %c0_40, %c0_41], %78 {strides = array<i32>} : memref<1x4x128xf32, #tpu.memory_space<vmem>>, vector<1x4x128xf32>,
    return
  }
  func.func @transform_0(%arg0: i32, %arg1: i32) -> (i32, i32, i32, i32) {
    %c1_i32 = arith.constant 1 : i32
    %0 = arith.muli %arg0, %c1_i32 : i32
    %1 = arith.addi %0, %arg1 : i32
    %c0_i32 = arith.constant 0 : i32
    %c0_i32_0 = arith.constant 0 : i32
    %c0_i32_1 = arith.constant 0 : i32
    %c0_i32_2 = arith.constant 0 : i32
    return %c0_i32, %c0_i32_0, %1, %c0_i32_1 : i32, i32, i32, i32
  }
  func.func @transform_1(%arg0: i32, %arg1: i32) -> (i32, i32, i32) {
    %c1_i32 = arith.constant 1 : i32
    %0 = arith.muli %arg0, %c1_i32 : i32
    %1 = arith.addi %0, %arg1 : i32
    %c0_i32 = arith.constant 0 : i32
    %c0_i32_0 = arith.constant 0 : i32
    %c0_i32_1 = arith.constant 0 : i32
    return %c0_i32, %1, %c0_i32_0 : i32, i32, i32
  }
  func.func @transform_2(%arg0: i32, %arg1: i32) -> (i32, i32, i32) {
    %c0_i32 = arith.constant 0 : i32
    %c0_i32_0 = arith.constant 0 : i32
    %c0_i32_1 = arith.constant 0 : i32
    return %arg0, %c0_i32, %c0_i32_0 : i32, i32, i32
  }
  func.func @transform_3(%arg0: i32, %arg1: i32) -> (i32, i32, i32) {
    %c0_i32 = arith.constant 0 : i32
    %c0_i32_0 = arith.constant 0 : i32
    %c0_i32_1 = arith.constant 0 : i32
    return %arg0, %c0_i32, %c0_i32_0 : i32, i32, i32
  }
  func.func @transform_4(%arg0: i32, %arg1: i32) -> (i32, i32, i32) {
    %c0_i32 = arith.constant 0 : i32
    %c0_i32_0 = arith.constant 0 : i32
    %c0_i32_1 = arith.constant 0 : i32
    return %arg0, %c0_i32, %c0_i32_0 : i32, i32, i32
  }
}

</mosaic_0001>

<bundles_post_ra>
// kernel: tpu_custom_call.1
= control target key start
LH: loop header
LB: loop body
LE: loop exit
PB: predicated region body
PF: predicated region fallthrough
CT: control target
= control target key end

     0   :  { %10 = vsyncpa [#allocation3], 0  ;;  %s599_s0 = inlined_call_operand.hbm [shape: f32[2,4,2,128], index: 0, kind: input, shape index: {}]   ;;  %s600_s1 = inlined_call_operand.hbm [shape: s32[2,2,128], index: 1, kind: input, shape index: {}]   ;;  %s601_s2 = inlined_call_operand.hbm [shape: f32[1,4,128], index: 2, kind: output, shape index: {0}]   ;;  %s602_s3 = inlined_call_operand.hbm [shape: f32[1,4,128], index: 3, kind: output, shape index: {1}]   ;;  %s603_s4 = inlined_call_operand.hbm [shape: f32[1,4,128], index: 4, kind: output, shape index: {2}]  }
   0x1   :  { %11 = vsyncpa [#allocation6], 0 }
   0x2   :  { %12 = vsyncpa [#allocation4], 0 }
   0x3   :  { %13 = vsyncpa [#allocation9], 0  ;;  %s21_s17 = sshll.u32 %s599_s0, 4  ;;  %s451_s18 = smov [#allocation2]   ;;  %s22_s17 = int_to_ptr.hbm [resolvable:$true] %s21_s17 }
   0x4   :  { %s23_s19 = sshll.u32 %s451_s18, 4  ;;  %s37_s22 = sshll.u32 %s600_s1, 4  ;;  %s24_s19 = int_to_ptr.vmem [resolvable:$true] %s23_s19  ;;  %s38_s22 = int_to_ptr.hbm [resolvable:$true] %s37_s22 }
   0x5   :  { %s452_s23 = smov 32   ;;  %s453_s24 = smov 2  }
   0x6   :  { %29 = dma.hbm_to_vmem [thread:$0]  %s22_s17, 256, %s24_s19, [#allocation3], %s452_s23, %s452_s23, %s453_s24  }
   0x7   :  { %s454_s25 = smov [#allocation5]  }
   0x8   :  { %s39_s26 = sshll.u32 %s454_s25, 4  ;;  %s40_s26 = int_to_ptr.vmem [resolvable:$true] %s39_s26 }
   0x9   :  { %45 = dma.hbm_to_vmem [thread:$0]  %s38_s22, 64, %s40_s26, [#allocation6], %s452_s23, %s452_s23, %s453_s24  }
   0xa   :  { %443 = dma.done.wait [#allocation3], 256  }
   0xb   :  { %444 = vsyncadd [#allocation3], 4294967040 }
   0xc   :  { %445 = dma.done.wait [#allocation6], 64  }
   0xd   :  { %446 = vsyncadd [#allocation6], 4294967232  ;;  %v455_v0 = vmov 0.0   ;;  %vm82_vm0 = vcmask 1041408   ;;  %v63_v1 = vld [vmem:[#allocation2] sm:$0x3] }
   0xe   :  { %61 = vst [vmem:[#allocation8] sm:$0xf] %v455_v0  ;;  %v64_v2 = vld [vmem:[#allocation2 + $0x2] sm:$0x3]  ;;  %v493_v3 = vld [vmem:[#allocation2 + $0x4] sm:$0x3]  ;;  %v74_v7 = vmul.f32 %v63_v1, %v63_v1 }
   0xf   :  { %60 = vst [vmem:[#allocation7] sm:$0xf] %v455_v0  ;;  %v495_v4 = vld [vmem:[#allocation2 + $0x6] sm:$0x3]  ;;  %v67_v5 = vld [vmem:[#allocation2 + $0x8] sm:$0x3]  ;;  %v75_v8 = vmul.f32 %v64_v2, %v64_v2  ;;  %v76_v9 = vmul.f32 %v493_v3, %v493_v3 }
  0x10   :  { %62 = vst [vmem:[#allocation10] sm:$0xf] %v455_v0  ;;  %v68_v6 = vld [vmem:[#allocation2 + $0xa] sm:$0x3]  ;;  %v499_v10 = vld [vmem:[#allocation2 + $0xc] sm:$0x3]  ;;  %v77_v12 = vmul.f32 %v495_v4, %v495_v4  ;;  %v78_v13 = vmul.f32 %v67_v5, %v67_v5 }
  0x11   :  { %v501_v11 = vld [vmem:[#allocation2 + $0xe] sm:$0x3]  ;;  %v79_v14 = vmul.f32 %v68_v6, %v68_v6  ;;  %v80_v15 = vmul.f32 %v499_v10, %v499_v10  ;;  %v83_v17 = vsel %vm82_vm0, %v74_v7, 0.0  ;;  %v92_v18 = vsel %vm82_vm0, %v75_v8, 0.0  ;;  %v511_v19 = vld [vmem:[#allocation5] sm:$0x3] }
  0x12   :  { %v81_v16 = vmul.f32 %v501_v11, %v501_v11  ;;  %v513_v20 = vld [vmem:[#allocation5 + $0x2] sm:$0x3]  ;;  %v84_v21 = vsel %vm82_vm0, %v78_v13, 0.0  ;;  %v101_v23 = vsel %vm82_vm0, %v76_v9, 0.0  ;;  %v110_v24 = vsel %vm82_vm0, %v77_v12, 0.0  ;;  %s456_s0 = smov [#allocation8]  }
  0x13   :  { %v93_v22 = vsel %vm82_vm0, %v79_v14, 0.0  ;;  %v85_v25 = vadd.f32 %v84_v21, %v83_v17  ;;  %v102_v27 = vsel %vm82_vm0, %v80_v15, 0.0  ;;  %vm132_vm1 = vcmp.eq.s32.totalorder %v511_v19, 0  ;;  %s274_s1 = sshll.u32 %s456_s0, 4  ;;  %s276_s29 = sshll.u32 %s602_s3, 4  ;;  %s275_s1 = int_to_ptr.vmem [resolvable:$true] %s274_s1  ;;  %s277_s29 = int_to_ptr.hbm [resolvable:$true] %s276_s29 }
  0x14   :  { %v94_v26 = vadd.f32 %v93_v22, %v92_v18  ;;  %v111_v28 = vsel %vm82_vm0, %v81_v16, 0.0  ;;  %v103_v29 = vadd.f32 %v102_v27, %v101_v23  ;;  %vm133_vm2 = vcmp.eq.s32.totalorder %v513_v20, 0  ;;  %s457_s3 = smov [#allocation7]   ;;  %s265_s7 = sshll.u32 %s601_s2, 4  ;;  %s266_s7 = int_to_ptr.hbm [resolvable:$true] %s265_s7 }
  0x15   :  { %v112_v30 = vadd.f32 %v111_v28, %v110_v24  ;;  %v86_v31 = vrot.slane %v85_v25, 4  ;;  %v524_v33 = vsel %vm132_vm1, 1.0, %v455_v0  ;;  %v527_v34 = vsel %vm133_vm2, 1.0, %v455_v0  ;;  %v73_v16 = vld [vmem:[#allocation8] sm:$0xf]  ;;  %s263_s30 = sshll.u32 %s457_s3, 4  ;;  %s264_s30 = int_to_ptr.vmem [resolvable:$true] %s263_s30 }
  0x16   :  { %v95_v32 = vrot.slane %v94_v26, 4  ;;  %v104_v35 = vrot.slane %v103_v29, 4  ;;  %vm123_vm3 = vcmask 1041409   ;;  %v138_v37 = vmul.f32 %v524_v33, %v63_v1  ;;  %s458_s2 = smov [#allocation10]   ;;  %s287_s11 = sshll.u32 %s603_s4, 4  ;;  %s288_s11 = int_to_ptr.hbm [resolvable:$true] %s287_s11 }
  0x17   :  { %v113_v36 = vrot.slane %v112_v30, 4  ;;  %v139_v38 = vmul.f32 %v527_v34, %v67_v5  ;;  %v87_v39 = vadd.f32 %v86_v31, %v85_v25  ;;  %vm125_vm4 = vcmask 1042434   ;;  %s285_s8 = sshll.u32 %s458_s2, 4  ;;  %s286_s8 = int_to_ptr.vmem [resolvable:$true] %s285_s8 }
  0x18   :  { %v96_v40 = vadd.f32 %v95_v32, %v94_v26  ;;  %vm160_vm5 = vcmp.eq.s32.totalorder %v511_v19, 1  ;;  %vm161_vm6 = vcmp.eq.s32.totalorder %v513_v20, 1  ;;  %v105_v41 = vadd.f32 %v104_v35, %v103_v29 }
  0x19   :  { %v114_v42 = vadd.f32 %v113_v36, %v112_v30  ;;  %vm127_vm7 = vcmask 1043459   ;;  %v140_v43 = vsel %vm82_vm0, %v138_v37, 0.0  ;;  %v141_v44 = vsel %vm82_vm0, %v139_v38, 0.0 }
  0x1a   :  { %v88_v45 = vrot.slane %v87_v39, 2  ;;  %v97_v46 = vrot.slane %v96_v40, 2  ;;  %v142_v47 = vadd.f32 %v141_v44, %v140_v43  ;;  %v536_v48 = vsel %vm160_vm5, 1.0, %v455_v0 }
  0x1b   :  { %v106_v49 = vrot.slane %v105_v41, 2  ;;  %v115_v50 = vrot.slane %v114_v42, 2  ;;  %v539_v51 = vsel %vm161_vm6, 1.0, %v455_v0  ;;  %v166_v52 = vmul.f32 %v536_v48, %v64_v2 }
  0x1c   :  { %v89_v53 = vadd.f32 %v88_v45, %v87_v39  ;;  %v98_v54 = vadd.f32 %v97_v46, %v96_v40  ;;  %v143_v55 = vsel %vm82_vm0, %v142_v47, 0.0  ;;  %v167_v56 = vmul.f32 %v539_v51, %v68_v6 }
  0x1d   :  { %v107_v57 = vadd.f32 %v106_v49, %v105_v41  ;;  %v116_v58 = vadd.f32 %v115_v50, %v114_v42  ;;  %v144_v59 = vrot.slane %v143_v55, 4  ;;  %v168_v60 = vsel %vm82_vm0, %v166_v52, 0.0 }
  0x1e   :  { %v90_v61 = vrot.slane %v89_v53, 1  ;;  %v99_v62 = vrot.slane %v98_v54, 1  ;;  %v169_v63 = vsel %vm82_vm0, %v167_v56, 0.0  ;;  %vm188_vm8 = vcmp.eq.s32.totalorder %v511_v19, 2 }
  0x1f   :  { %v108_v1 = vrot.slane %v107_v57, 1  ;;  %v117_v5 = vrot.slane %v116_v58, 1  ;;  %v145_v2 = vadd.f32 %v144_v59, %v143_v55  ;;  %v170_v7 = vadd.f32 %v169_v63, %v168_v60 }
  0x20   :  { %v91_v8 = vadd.f32 %v90_v61, %v89_v53  ;;  %v100_v9 = vadd.f32 %v99_v62, %v98_v54  ;;  %vm189_vm9 = vcmp.eq.s32.totalorder %v513_v20, 2  ;;  %v311_v6 = vsel %vm188_vm8, 1.0, %v455_v0 }
  0x21   :  { %v109_v12 = vadd.f32 %v108_v1, %v107_v57  ;;  %v118_v13 = vadd.f32 %v117_v5, %v116_v58  ;;  %v146_v14 = vrot.slane %v145_v2, 2  ;;  %v171_v15 = vsel %vm82_vm0, %v170_v7, 0.0 }
  0x22   :  { %v124_v17 = vsel %vm123_vm3, %v100_v9, %v91_v8  ;;  %v172_v18 = vrot.slane %v171_v15, 4  ;;  %v312_v21 = vsel %vm189_vm9, 1.0, %v455_v0  ;;  %v194_v22 = vmul.f32 %v311_v6, %v493_v3 }
  0x23   :  { %v126_v23 = vsel %vm125_vm4, %v109_v12, %v124_v17  ;;  %v147_v24 = vadd.f32 %v146_v14, %v145_v2  ;;  %v195_v25 = vmul.f32 %v312_v21, %v499_v10  ;;  %vm216_vm10 = vcmp.eq.s32.totalorder %v511_v19, 3 }
  0x24   :  { %v128_v26 = vsel %vm127_vm7, %v118_v13, %v126_v23  ;;  %v173_v27 = vadd.f32 %v172_v18, %v171_v15  ;;  %v196_v28 = vsel %vm82_vm0, %v194_v22, 0.0  ;;  %vm217_vm11 = vcmp.eq.s32.totalorder %v513_v20, 3 }
  0x25   :  { %v130_v3 = vadd.f32 %v128_v26, %v73_v16  ;;  %v148_v29 = vrot.slane %v147_v24, 1  ;;  %v197_v30 = vsel %vm82_vm0, %v195_v25, 0.0  ;;  %v313_v31 = vsel %vm216_vm10, 1.0, %v455_v0 }
  0x26   :  { %v174_v32 = vrot.slane %v173_v27, 2  ;;  %v198_v35 = vadd.f32 %v197_v30, %v196_v28  ;;  %v314_v10 = vsel %vm217_vm11, 1.0, %v455_v0  ;;  %v222_v19 = vmul.f32 %v313_v31, %v495_v4  ;;  %v244_v28 = vld [vmem:[#allocation7] sm:$0xf] }
  0x27   :  { %131 = vst [vmem:[#allocation8] sm:$0xf] %v130_v3  ;;  %v149_v36 = vadd.f32 %v148_v29, %v147_v24  ;;  %v223_v37 = vmul.f32 %v314_v10, %v501_v11  ;;  %v150_v40 = vsel %vm82_vm0, %v524_v33, 0.0  ;;  %v151_v0 = vsel %vm82_vm0, %v527_v34, 0.0 }
  0x28   :  { %v175_v38 = vadd.f32 %v174_v32, %v173_v27  ;;  %v199_v20 = vsel %vm82_vm0, %v198_v35, 0.0  ;;  %v224_v39 = vsel %vm82_vm0, %v222_v19, 0.0  ;;  %279 = dma.vmem_to_hbm [thread:$0]  %s275_s1, 64, %s277_s29, [#allocation9]   ;;  %v178_v4 = vsel %vm82_vm0, %v536_v48, 0.0 }
  0x29   :  { %v200_v41 = vrot.slane %v199_v20, 4  ;;  %v225_v42 = vsel %vm82_vm0, %v223_v37, 0.0  ;;  %v152_v44 = vadd.f32 %v151_v0, %v150_v40  ;;  %v179_v45 = vsel %vm82_vm0, %v539_v51, 0.0  ;;  %v252_v40 = vld [vmem:[#allocation10] sm:$0xf] }
  0x2a   :  { %v176_v43 = vrot.slane %v175_v38, 1  ;;  %v226_v11 = vadd.f32 %v225_v42, %v224_v39  ;;  %v180_v47 = vadd.f32 %v179_v45, %v178_v4  ;;  %v206_v33 = vsel %vm82_vm0, %v311_v6, 0.0 }
  0x2b   :  { %v201_v46 = vadd.f32 %v200_v41, %v199_v20  ;;  %v207_v49 = vsel %vm82_vm0, %v312_v21, 0.0  ;;  %vm245_vm12 = vcmask 1040384   ;;  %v153_v34 = vsel %vm82_vm0, %v152_v44, 0.0 }
  0x2c   :  { %v227_v50 = vsel %vm82_vm0, %v226_v11, 0.0  ;;  %v208_v52 = vadd.f32 %v207_v49, %v206_v33  ;;  %v154_v54 = vrot.slane %v153_v34, 4  ;;  %v181_v55 = vsel %vm82_vm0, %v180_v47, 0.0 }
  0x2d   :  { %v202_v53 = vrot.slane %v201_v46, 2  ;;  %v228_v48 = vrot.slane %v227_v50, 4  ;;  %v177_v56 = vadd.f32 %v176_v43, %v175_v38  ;;  %v182_v57 = vrot.slane %v181_v55, 4 }
  0x2e   :  { %v209_v51 = vsel %vm82_vm0, %v208_v52, 0.0  ;;  %v234_v58 = vsel %vm82_vm0, %v313_v31, 0.0  ;;  %v155_v61 = vadd.f32 %v154_v54, %v153_v34  ;;  %v235_v1 = vsel %vm82_vm0, %v314_v10, 0.0 }
  0x2f   :  { %v203_v59 = vadd.f32 %v202_v53, %v201_v46  ;;  %v229_v60 = vadd.f32 %v228_v48, %v227_v50  ;;  %v210_v62 = vrot.slane %v209_v51, 4  ;;  %v183_v63 = vadd.f32 %v182_v57, %v181_v55 }
  0x30   :  { %v156_v7 = vrot.slane %v155_v61, 2  ;;  %v246_v9 = vsel %vm245_vm12, %v149_v36, %v177_v56  ;;  %v236_v12 = vadd.f32 %v235_v1, %v234_v58  ;;  %vm248_vm13 = vcmask 1042432  }
  0x31   :  { %v204_v5 = vrot.slane %v203_v59, 1  ;;  %v230_v2 = vrot.slane %v229_v60, 2  ;;  %v211_v8 = vadd.f32 %v210_v62, %v209_v51  ;;  %v184_v6 = vrot.slane %v183_v63, 2 }
  0x32   :  { %v157_v15 = vadd.f32 %v156_v7, %v155_v61  ;;  %v237_v18 = vsel %vm82_vm0, %v236_v12, 0.0 }
  0x33   :  { %v205_v13 = vadd.f32 %v204_v5, %v203_v59  ;;  %v231_v14 = vadd.f32 %v230_v2, %v229_v60  ;;  %v212_v16 = vrot.slane %v211_v8, 2  ;;  %v185_v17 = vadd.f32 %v184_v6, %v183_v63 }
  0x34   :  { %v158_v22 = vrot.slane %v157_v15, 1  ;;  %v238_v26 = vrot.slane %v237_v18, 4 }
  0x35   :  { %v232_v21 = vrot.slane %v231_v14, 1  ;;  %v213_v23 = vadd.f32 %v212_v16, %v211_v8  ;;  %v247_v24 = vsel %vm82_vm0, %v246_v9, %v205_v13  ;;  %v186_v25 = vrot.slane %v185_v17, 1 }
  0x36   :  { %v159_v29 = vadd.f32 %v158_v22, %v157_v15  ;;  %v239_v31 = vadd.f32 %v238_v26, %v237_v18 }
  0x37   :  { %v233_v27 = vadd.f32 %v232_v21, %v231_v14  ;;  %v214_v3 = vrot.slane %v213_v23, 1  ;;  %v187_v30 = vadd.f32 %v186_v25, %v185_v17 }
  0x38   :  { %v240_v10 = vrot.slane %v239_v31, 2 }
  0x39   :  { %v249_v32 = vsel %vm248_vm13, %v247_v24, %v233_v27  ;;  %v215_v19 = vadd.f32 %v214_v3, %v213_v23  ;;  %v253_v37 = vsel %vm245_vm12, %v159_v29, %v187_v30 }
  0x3a   :  { %v250_v35 = vadd.f32 %v249_v32, %v244_v28  ;;  %v241_v36 = vadd.f32 %v240_v10, %v239_v31 }
  0x3b   :  { %v254_v20 = vsel %vm82_vm0, %v253_v37, %v215_v19 }
  0x3c   :  { %251 = vst [vmem:[#allocation7] sm:$0xf] %v250_v35  ;;  %v242_v38 = vrot.slane %v241_v36, 1 }
  0x3d   :  { %268 = dma.vmem_to_hbm [thread:$0]  %s264_s30, 64, %s266_s7, [#allocation4]  }
  0x3e   :  { %v243_v39 = vadd.f32 %v242_v38, %v241_v36 }
  0x40   :  { %v255_v41 = vsel %vm248_vm13, %v254_v20, %v243_v39 }
  0x41   :  { %v256_v42 = vadd.f32 %v255_v41, %v252_v40 }
  0x43   :  { %257 = vst [vmem:[#allocation10] sm:$0xf] %v256_v42 }
  0x44   :  { %290 = dma.vmem_to_hbm [thread:$0]  %s286_s8, 64, %s288_s11, [#allocation9]  }
  0x45   :  { %447 = dma.done.wait [#allocation4], 64  }
  0x46   :  { %448 = vsyncadd [#allocation4], 4294967232 }
  0x47   :  { %449 = dma.done.wait [#allocation9], 128  }
  0x48   :  { %450 = vsyncadd [#allocation9], 4294967168 }
  0x49   :  { %303 = vsyncpa [#allocation3], 1 }
  0x4a   :  { %304 = vsyncpa [#allocation6], 1 }
  0x4b   :  { %305 = vsyncpa [#allocation4], 1 }
  0x4c   :  { %306 = vsyncpa [#allocation9], 1 }

</bundles_post_ra>
